<compile_context>
chip_gen: v6e
topology: v6e:2x2x1
jax: 0.10.0
libtpu: 0.0.40
codegen_flags: <defaults>
</compile_context>

<pallas_src>
import functools

import jax
import jax.numpy as jnp
from jax.experimental import pallas as pl
from jax.experimental.pallas import tpu as pltpu

# Logical / padded geometry.
D_IN = 784
D_H1 = 128
D_H2, D_H2_PAD = 16, 128
D_OUT = 10


def _round_up(x, m):
    return (x + m - 1) // m * m


def _mlp_kernel(x_ref, w1_ref, b1_ref, w2_ref, b2_ref, w3_ref, b3_ref, o_ref):
    # f32 tile -> bf16 inside the kernel (cast is VPU work with huge slack).
    x = x_ref[...].astype(jnp.bfloat16)
    # fc1 + ReLU (bf16 operands, f32 accumulation on the MXU).
    h1 = jnp.dot(x, w1_ref[...], preferred_element_type=jnp.float32)
    h1 = jnp.maximum(h1 + b1_ref[...], 0.0).astype(jnp.bfloat16)
    # fc2 + ReLU (hidden dim zero-padded to 128 lanes; exact).
    h2 = jnp.dot(h1, w2_ref[...], preferred_element_type=jnp.float32)
    h2 = jnp.maximum(h2 + b2_ref[...], 0.0).astype(jnp.bfloat16)
    # fc3 -> (TB, 10) logits written directly.
    o_ref[...] = (jnp.dot(h2, w3_ref[...], preferred_element_type=jnp.float32)
                  + b3_ref[...])


def prepare_params(params):
    """One-time weight prep (call at model-init time, NOT per forward).

    Pads the narrow fc2-out / fc3-in dims to 128 with exact zeros, casts
    weights to bf16 (f32 accumulation in the kernel), keeps biases in f32.
    """
    w1, b1, w2, b2, w3, b3 = params
    w1p = w1.astype(jnp.bfloat16)                                   # (784, 128)
    b1p = b1.reshape(1, D_H1).astype(jnp.float32)                   # (1, 128)
    w2p = jnp.zeros((D_H1, D_H2_PAD), jnp.float32).at[:, :D_H2].set(w2)
    b2p = jnp.zeros((1, D_H2_PAD), jnp.float32).at[:, :D_H2].set(b2.reshape(1, D_H2))
    w3p = jnp.zeros((D_H2_PAD, D_OUT), jnp.float32).at[:D_H2, :].set(w3)
    b3p = b3.reshape(1, D_OUT).astype(jnp.float32)
    return (w1p, b1p, w2p.astype(jnp.bfloat16), b2p,
            w3p.astype(jnp.bfloat16), b3p)


def mnist_forward(x, prepped, *, block_b=1024):
    """Forward pass. x: any shape whose trailing dims flatten to 784.

    `prepped` must come from prepare_params (weights already padded/cast)."""
    w1p, b1p, w2p, b2p, w3p, b3p = prepped

    x2d = x.reshape(-1, D_IN).astype(jnp.float32)    # mirrors x.view(-1, 784)
    B = x2d.shape[0]

    # Batch tile: multiple of 16, aim for >=2 grid steps so v7x megacore can
    # shard the "parallel" batch axis across both TensorCores.
    tb_target = max(16, _round_up(pl.cdiv(B, 2), 16))
    TB = min(block_b, tb_target)
    n_tiles = pl.cdiv(B, TB)
    Bp = n_tiles * TB

    # Only the ragged remainder (if any) is zero-padded; no full copy of x.
    if Bp != B:
        x2d = jnp.pad(x2d, ((0, Bp - B), (0, 0)))

    flops = 2 * Bp * (D_IN * D_H1 + D_H1 * D_H2_PAD + D_H2_PAD * D_OUT)
    bytes_accessed = (Bp * D_IN * 4 + Bp * D_OUT * 4                 # x in, logits out
                      + D_IN * D_H1 * 2                               # w1 (bf16)
                      + D_H1 * D_H2_PAD * 2 + D_H2_PAD * D_OUT * 2    # w2, w3 (bf16)
                      + (D_H1 + D_H2_PAD + D_OUT) * 4)                # biases (f32)

    full = lambda i: (0, 0)   # weights/biases: same full-array block every step
    out = pl.pallas_call(
        _mlp_kernel,
        out_shape=jax.ShapeDtypeStruct((Bp, D_OUT), jnp.float32),
        grid_spec=pltpu.PrefetchScalarGridSpec(
            num_scalar_prefetch=0,
            grid=(n_tiles,),
            in_specs=[
                pl.BlockSpec((TB, D_IN), lambda i: (i, 0)),   # x tile (pipelined)
                pl.BlockSpec((D_IN, D_H1), full),             # w1 (VMEM resident)
                pl.BlockSpec((1, D_H1), full),                # b1
                pl.BlockSpec((D_H1, D_H2_PAD), full),         # w2
                pl.BlockSpec((1, D_H2_PAD), full),            # b2
                pl.BlockSpec((D_H2_PAD, D_OUT), full),        # w3
                pl.BlockSpec((1, D_OUT), full),               # b3
            ],
            out_specs=pl.BlockSpec((TB, D_OUT), lambda i: (i, 0)),
        ),
        compiler_params=pltpu.CompilerParams(
            dimension_semantics=("parallel",),
            # TB=1024 working set (2x 3.2 MB x tiles + weights + intermediates)
            # is ~8 MiB; set the limit explicitly so v5e's 16 MiB scoped default
            # never becomes a surprise if block_b is raised.
            vmem_limit_bytes=32 * 1024 * 1024,
        ),
        cost_estimate=pl.CostEstimate(flops=flops, transcendentals=0,
                                      bytes_accessed=bytes_accessed),
    )(x2d, w1p, b1p, w2p, b2p, w3p, b3p)

    return out[:B]


def init_params(key):
    """Deterministic init matching PyTorch nn.Linear default U(-1/sqrt(fan_in), +).
    Weights stored as (in, out) (transposed vs PyTorch); biases as (out,)."""
    shapes = [(D_IN, D_H1), (D_H1, D_H2), (D_H2, D_OUT)]
    params = []
    for i, (fan_in, fan_out) in enumerate(shapes):
        kw, kb = jax.random.split(jax.random.fold_in(key, i))
        bound = 1.0 / (fan_in ** 0.5)
        w = jax.random.uniform(kw, (fan_in, fan_out), jnp.float32, -bound, bound)
        b = jax.random.uniform(kb, (fan_out,), jnp.float32, -bound, bound)
        params += [w, b]
    return tuple(params)


def _reference_bf16(x, params):
    """Pure-JAX reference mirroring the kernel's bf16-input / f32-accumulate math."""
    w1, b1, w2, b2, w3, b3 = params
    x2d = x.reshape(-1, D_IN).astype(jnp.bfloat16)
    h1 = jnp.dot(x2d, w1.astype(jnp.bfloat16),
                 preferred_element_type=jnp.float32) + b1
    h1 = jnp.maximum(h1, 0.0).astype(jnp.bfloat16)
    h2 = jnp.dot(h1, w2.astype(jnp.bfloat16),
                 preferred_element_type=jnp.float32) + b2
    h2 = jnp.maximum(h2, 0.0).astype(jnp.bfloat16)
    return jnp.dot(h2, w3.astype(jnp.bfloat16),
                   preferred_element_type=jnp.float32) + b3


def _reference_f32(x, params):
    """Full-f32 reference == the original PyTorch forward semantics."""
    w1, b1, w2, b2, w3, b3 = params
    x2d = x.reshape(-1, D_IN).astype(jnp.float32)
    h1 = jnp.maximum(x2d @ w1 + b1, 0.0)
    h2 = jnp.maximum(h1 @ w2 + b2, 0.0)
    return h2 @ w3 + b3


if __name__ == "__main__":
    key = jax.random.PRNGKey(0)
    params = init_params(key)
    prepped = prepare_params(params)   # one-time weight pad/cast, outside jit

    # Small MNIST-shaped batch: (B, 1, 28, 28) NCHW, flattened to 784 in wrapper.
    x = jax.random.normal(jax.random.fold_in(key, 100), (8, 1, 28, 28), jnp.float32)

    fwd = jax.jit(functools.partial(mnist_forward, block_b=1024))
    out = jax.block_until_ready(fwd(x, prepped))

    assert out.shape == (8, D_OUT)
    # Tight check against a reference that mirrors the kernel's bf16 math.
    ref_bf16 = _reference_bf16(x, params)
    assert jnp.allclose(out, ref_bf16, atol=1e-3, rtol=1e-3)
    # Looser sanity check against the exact f32 (PyTorch-equivalent) forward.
    ref_f32 = _reference_f32(x, params)
    assert jnp.allclose(out, ref_f32, atol=5e-2, rtol=5e-2)
    print("KERNEL_OK")
</pallas_src>

<mosaic_0001>
module attributes {stable_mosaic.version = 11 : i64} {
  func.func @_mlp_kernel(%arg0: i32, %arg1: memref<16x784xf32, #tpu.memory_space<vmem>>, %arg2: memref<784x128xbf16, #tpu.memory_space<vmem>>, %arg3: memref<1x128xf32, #tpu.memory_space<vmem>>, %arg4: memref<128x128xbf16, #tpu.memory_space<vmem>>, %arg5: memref<1x128xf32, #tpu.memory_space<vmem>>, %arg6: memref<128x10xbf16, #tpu.memory_space<vmem>>, %arg7: memref<1x10xf32, #tpu.memory_space<vmem>>, %arg8: memref<16x10xf32, #tpu.memory_space<vmem>>) attributes {dimension_semantics = [#tpu.dimension_semantics<parallel>], iteration_bounds = array<i64: 1>, scalar_prefetch = 0 : i64, scratch_operands = 0 : i64, tpu.core_type = #tpu.core_type<tc>, window_params = [{transform_indices = @transform_0, window_bounds = array<i64: 16, 784>}, {pipeline_mode = #tpu.pipeline_mode<synchronous>, transform_indices = @transform_1, window_bounds = array<i64: 784, 128>}, {pipeline_mode = #tpu.pipeline_mode<synchronous>, transform_indices = @transform_2, window_bounds = array<i64: 1, 128>}, {pipeline_mode = #tpu.pipeline_mode<synchronous>, transform_indices = @transform_3, window_bounds = array<i64: 128, 128>}, {pipeline_mode = #tpu.pipeline_mode<synchronous>, transform_indices = @transform_4, window_bounds = array<i64: 1, 128>}, {pipeline_mode = #tpu.pipeline_mode<synchronous>, transform_indices = @transform_5, window_bounds = array<i64: 128, 10>}, {pipeline_mode = #tpu.pipeline_mode<synchronous>, transform_indices = @transform_6, window_bounds = array<i64: 1, 10>}, {transform_indices = @transform_7, window_bounds = array<i64: 16, 10>}]} {
    %c0 = arith.constant 0 : index
    %c0_0 = arith.constant 0 : index
    %0 = vector.load %arg1[%c0, %c0_0] : memref<16x784xf32, #tpu.memory_space<vmem>>, vector<16x784xf32>
    %1 = arith.truncf %0 : vector<16x784xf32> to vector<16x784xbf16>
    %c0_1 = arith.constant 0 : index
    %c0_2 = arith.constant 0 : index
    %2 = vector.load %arg2[%c0_1, %c0_2] : memref<784x128xbf16, #tpu.memory_space<vmem>>, vector<784x128xbf16>
    %cst = arith.constant dense<0.000000e+00> : vector<16x128xf32>
    %3 = tpu.matmul %1, %2, %cst {dimension_numbers = #tpu.dot_dimension_numbers<[1], [0], [0], [1], [0, 0, 1, 1], [], []>} : vector<16x784xbf16>, vector<784x128xbf16>, vector<16x128xf32> -> vector<16x128xf32>
    %c0_3 = arith.constant 0 : index
    %c0_4 = arith.constant 0 : index
    %4 = vector.load %arg3[%c0_3, %c0_4] : memref<1x128xf32, #tpu.memory_space<vmem>>, vector<1x128xf32>
    %5 = vector.broadcast %4 : vector<1x128xf32> to vector<16x128xf32>
    %6 = arith.addf %3, %5 : vector<16x128xf32>
    %cst_5 = arith.constant 0.000000e+00 : f32
    %7 = vector.broadcast %cst_5 : f32 to vector<16x128xf32>
    %8 = arith.maximumf %6, %7 : vector<16x128xf32>
    %9 = arith.truncf %8 : vector<16x128xf32> to vector<16x128xbf16>
    %c0_6 = arith.constant 0 : index
    %c0_7 = arith.constant 0 : index
    %10 = vector.load %arg4[%c0_6, %c0_7] : memref<128x128xbf16, #tpu.memory_space<vmem>>, vector<128x128xbf16>
    %cst_8 = arith.constant dense<0.000000e+00> : vector<16x128xf32>
    %11 = tpu.matmul %9, %10, %cst_8 {dimension_numbers = #tpu.dot_dimension_numbers<[1], [0], [0], [1], [0, 0, 1, 1], [], []>} : vector<16x128xbf16>, vector<128x128xbf16>, vector<16x128xf32> -> vector<16x128xf32>
    %c0_9 = arith.constant 0 : index
    %c0_10 = arith.constant 0 : index
    %12 = vector.load %arg5[%c0_9, %c0_10] : memref<1x128xf32, #tpu.memory_space<vmem>>, vector<1x128xf32>
    %13 = vector.broadcast %12 : vector<1x128xf32> to vector<16x128xf32>
    %14 = arith.addf %11, %13 : vector<16x128xf32>
    %cst_11 = arith.constant 0.000000e+00 : f32
    %15 = vector.broadcast %cst_11 : f32 to vector<16x128xf32>
    %16 = arith.maximumf %14, %15 : vector<16x128xf32>
    %17 = arith.truncf %16 : vector<16x128xf32> to vector<16x128xbf16>
    %c0_12 = arith.constant 0 : index
    %c0_13 = arith.constant 0 : index
    %18 = vector.load %arg6[%c0_12, %c0_13] : memref<128x10xbf16, #tpu.memory_space<vmem>>, vector<128x10xbf16>
    %cst_14 = arith.constant dense<0.000000e+00> : vector<16x10xf32>
    %19 = tpu.matmul %17, %18, %cst_14 {dimension_numbers = #tpu.dot_dimension_numbers<[1], [0], [0], [1], [0, 0, 1, 1], [], []>} : vector<16x128xbf16>, vector<128x10xbf16>, vector<16x10xf32> -> vector<16x10xf32>
    %c0_15 = arith.constant 0 : index
    %c0_16 = arith.constant 0 : index
    %20 = vector.load %arg7[%c0_15, %c0_16] : memref<1x10xf32, #tpu.memory_space<vmem>>, vector<1x10xf32>
    %21 = vector.broadcast %20 : vector<1x10xf32> to vector<16x10xf32>
    %22 = arith.addf %19, %21 : vector<16x10xf32>
    %c0_17 = arith.constant 0 : index
    %c0_18 = arith.constant 0 : index
    %23 = vector.load %arg8[%c0_17, %c0_18] : memref<16x10xf32, #tpu.memory_space<vmem>>, vector<16x10xf32>
    tpu.vector_store %arg8[%c0_17, %c0_18], %22 {strides = array<i32>} : memref<16x10xf32, #tpu.memory_space<vmem>>, vector<16x10xf32>,
    return
  }
  func.func @transform_0(%arg0: i32) -> (i32, i32) {
    %c0_i32 = arith.constant 0 : i32
    %c0_i32_0 = arith.constant 0 : i32
    return %arg0, %c0_i32 : i32, i32
  }
  func.func @transform_1(%arg0: i32) -> (i32, i32) {
    %c0_i32 = arith.constant 0 : i32
    %c0_i32_0 = arith.constant 0 : i32
    %c0_i32_1 = arith.constant 0 : i32
    return %c0_i32, %c0_i32_0 : i32, i32
  }
  func.func @transform_2(%arg0: i32) -> (i32, i32) {
    %c0_i32 = arith.constant 0 : i32
    %c0_i32_0 = arith.constant 0 : i32
    %c0_i32_1 = arith.constant 0 : i32
    return %c0_i32, %c0_i32_0 : i32, i32
  }
  func.func @transform_3(%arg0: i32) -> (i32, i32) {
    %c0_i32 = arith.constant 0 : i32
    %c0_i32_0 = arith.constant 0 : i32
    %c0_i32_1 = arith.constant 0 : i32
    return %c0_i32, %c0_i32_0 : i32, i32
  }
  func.func @transform_4(%arg0: i32) -> (i32, i32) {
    %c0_i32 = arith.constant 0 : i32
    %c0_i32_0 = arith.constant 0 : i32
    %c0_i32_1 = arith.constant 0 : i32
    return %c0_i32, %c0_i32_0 : i32, i32
  }
  func.func @transform_5(%arg0: i32) -> (i32, i32) {
    %c0_i32 = arith.constant 0 : i32
    %c0_i32_0 = arith.constant 0 : i32
    %c0_i32_1 = arith.constant 0 : i32
    return %c0_i32, %c0_i32_0 : i32, i32
  }
  func.func @transform_6(%arg0: i32) -> (i32, i32) {
    %c0_i32 = arith.constant 0 : i32
    %c0_i32_0 = arith.constant 0 : i32
    %c0_i32_1 = arith.constant 0 : i32
    return %c0_i32, %c0_i32_0 : i32, i32
  }
  func.func @transform_7(%arg0: i32) -> (i32, i32) {
    %c0_i32 = arith.constant 0 : i32
    %c0_i32_0 = arith.constant 0 : i32
    return %arg0, %c0_i32 : i32, i32
  }
}

</mosaic_0001>

<bundles_post_ra>
// kernel: mnist_forward.1
= control target key start
LH: loop header
LB: loop body
LE: loop exit
PB: predicated region body
PF: predicated region fallthrough
CT: control target
= control target key end

     0   :  { %v1120_v43 = vmov 0.0   ;;  %vm1121_vm0 = vmmov 0   ;;  %vm447_vm1 = vcmask 130048   ;;  %vm845_vm2 = vcmask 80896   ;;  %s1437_s1 = inlined_call_operand.vmem [shape: bf16[784,128], index: 1, kind: input, shape index: {}]   ;;  %s1438_s0 = inlined_call_operand.vmem [shape: f32[16,784], index: 0, kind: input, shape index: {}]   ;;  %s1439_s3 = inlined_call_operand.vmem [shape: bf16[128,128], index: 3, kind: input, shape index: {}]   ;;  %s1440_s5 = inlined_call_operand.vmem [shape: bf16[128,10], index: 5, kind: input, shape index: {}]   ;;  %s1441_s2 = inlined_call_operand.vmem [shape: f32[1,128], index: 2, kind: input, shape index: {}]   ;;  %s1442_s4 = inlined_call_operand.vmem [shape: f32[1,128], index: 4, kind: input, shape index: {}]   ;;  %s1443_s6 = inlined_call_operand.vmem [shape: f32[1,10], index: 6, kind: input, shape index: {}]   ;;  %s1444_s7 = inlined_call_operand.vmem [shape: f32[16,10], index: 7, kind: output, shape index: {}]  }
   0x1   :  { %v1055_v0 = vld [vmem:[%s1437_s1 + $0x78] sm:$0xff]   ;;  %v1059_v4 = vld [vmem:[%s1437_s1 + $0x70] sm:$0xff]   ;;  %v1063_v8 = vld [vmem:[%s1437_s1 + $0x68] sm:$0xff]  }
   0x2   :  { %v1056_v1 = vld [vmem:[%s1437_s1 + $0x38] sm:$0xff]   ;;  %921 = vmatprep.subr.bf16.mxu0 %v1055_v0  ;;  %v1060_v5 = vld [vmem:[%s1437_s1 + $0x30] sm:$0xff]   ;;  %v1064_v9 = vld [vmem:[%s1437_s1 + $0x28] sm:$0xff]  }
   0x3   :  { %v1057_v2 = vld [vmem:[%s1437_s1 + $0xf8] sm:$0xff]   ;;  %922 = vmatpush3.bf16.msra.mxu0 %v1056_v1  ;;  %v1061_v6 = vld [vmem:[%s1437_s1 + $0xf0] sm:$0xff]   ;;  %v1065_v10 = vld [vmem:[%s1437_s1 + $0xe8] sm:$0xff]  }
   0x4   :  { %v1058_v3 = vld [vmem:[%s1437_s1 + $0xb8] sm:$0xff]   ;;  %943 = vmatprep.subr.bf16.mxu1 %v1057_v2  ;;  %923 = vmatprep.subr.bf16.mxu0 %v1059_v4  ;;  %v1062_v7 = vld [vmem:[%s1437_s1 + $0xb0] sm:$0xff]   ;;  %v1066_v11 = vld [vmem:[%s1437_s1 + $0xa8] sm:$0xff]  }
   0x5   :  { %944 = vmatpush3.bf16.msra.mxu1 %v1058_v3  ;;  %v1067_v12 = vld [vmem:[%s1437_s1 + $0x60] sm:$0xff]   ;;  %v1071_v16 = vld [vmem:[%s1437_s1 + $0x58] sm:$0xff]   ;;  %v1075_v20 = vld [vmem:[%s1437_s1 + $0x50] sm:$0xff]  }
   0x6   :  { %945 = vmatprep.subr.bf16.mxu1 %v1061_v6  ;;  %v1068_v13 = vld [vmem:[%s1437_s1 + $0x20] sm:$0xff]   ;;  %v1072_v17 = vld [vmem:[%s1437_s1 + $0x18] sm:$0xff]   ;;  %v1076_v21 = vld [vmem:[%s1437_s1 + $0x10] sm:$0xff]  }
   0x7   :  { %924 = vmatpush3.bf16.msra.mxu0 %v1060_v5  ;;  %v1069_v14 = vld [vmem:[%s1437_s1 + $0xe0] sm:$0xff]   ;;  %v1073_v18 = vld [vmem:[%s1437_s1 + $0xd8] sm:$0xff]   ;;  %v1077_v22 = vld [vmem:[%s1437_s1 + $0xd0] sm:$0xff]  }
   0x8   :  { %925 = vmatprep.subr.bf16.mxu0 %v1063_v8  ;;  %v1070_v15 = vld [vmem:[%s1437_s1 + $0xa0] sm:$0xff]   ;;  %v1074_v19 = vld [vmem:[%s1437_s1 + $0x98] sm:$0xff]   ;;  %v1078_v23 = vld [vmem:[%s1437_s1 + $0x90] sm:$0xff]  }
   0x9   :  { %946 = vmatpush3.bf16.msra.mxu1 %v1062_v7  ;;  %v1079_v24 = vld [vmem:[%s1437_s1 + $0x48] sm:$0xff]   ;;  %v1083_v28 = vld [vmem:[%s1437_s1 + $0x40] sm:$0xff]   ;;  %v34_v36 = vld [vmem:[%s1438_s0 + $0x38] sm:$0xff] }
   0xa   :  { %947 = vmatprep.subr.bf16.mxu1 %v1065_v10  ;;  %v1080_v25 = vld [vmem:[%s1437_s1 + $0x8] sm:$0xff]   ;;  %v1084_v29 = vld [vmem:[%s1437_s1] sm:$0xff]   ;;  %v1087_v38 = vld [vmem:[%s1437_s1 + $0x178] sm:$0xff]  }
   0xb   :  { %926 = vmatpush3.bf16.msra.mxu0 %v1064_v9  ;;  %v1081_v26 = vld [vmem:[%s1437_s1 + $0xc8] sm:$0xff]   ;;  %v1085_v30 = vld [vmem:[%s1437_s1 + $0xc0] sm:$0xff]   ;;  %v30_v39 = vld [vmem:[%s1438_s0 + $0x18] sm:$0xff] }
   0xc   :  { %927 = vmatprep.subr.bf16.mxu0 %v1067_v12  ;;  %v1082_v27 = vld [vmem:[%s1437_s1 + $0x88] sm:$0xff]   ;;  %v35_v32 = vld [vmem:[%s1438_s0 + $0x40] sm:$0xff]  ;;  %v37_v40 = vld [vmem:[%s1438_s0 + $0x50] sm:$0xff] }
   0xd   :  { %948 = vmatpush3.bf16.msra.mxu1 %v1066_v11  ;;  %v28_v31 = vld [vmem:[%s1438_s0 + $0x8] sm:$0xff]  ;;  %v1086_v34 = vld [vmem:[%s1437_s1 + $0x80] sm:$0xff]   ;;  %v44_v41 = vpack.c.bf16 %v37_v40, %v30_v39  ;;  %v1088_v42 = vld [vmem:[%s1437_s1 + $0x138] sm:$0xff]  }
   0xe   :  { %949 = vmatprep.subr.bf16.mxu1 %v1069_v14  ;;  %v42_v33 = vpack.c.bf16 %v35_v32, %v28_v31  ;;  %v27_v35 = vld [vmem:[%s1438_s0] sm:$0xff]  ;;  %v29_v44 = vld [vmem:[%s1438_s0 + $0x10] sm:$0xff]  ;;  %v36_v45 = vld [vmem:[%s1438_s0 + $0x48] sm:$0xff] }
   0xf   :  { %928 = vmatpush3.bf16.msra.mxu0 %v1068_v13  ;;  %v41_v37 = vpack.c.bf16 %v34_v36, %v27_v35  ;;  %524 = vmatprep.mubr.bf16.mxu1 %v44_v41  ;;  %v43_v46 = vpack.c.bf16 %v36_v45, %v29_v44  ;;  %v1089_v47 = vld [vmem:[%s1437_s1 + $0x170] sm:$0xff]   ;;  %v1091_v49 = vld [vmem:[%s1437_s1 + $0x168] sm:$0xff]   ;;  %v1093_v51 = vld [vmem:[%s1437_s1 + $0x160] sm:$0xff]  }
  0x10   :  { %929 = vmatprep.subr.bf16.mxu0 %v1071_v16  ;;  %483 = vmatprep.mubr.bf16.mxu0 %v42_v33  ;;  %v1090_v48 = vld [vmem:[%s1437_s1 + $0x130] sm:$0xff]   ;;  %v1092_v50 = vld [vmem:[%s1437_s1 + $0x128] sm:$0xff]   ;;  %v1094_v52 = vld [vmem:[%s1437_s1 + $0x120] sm:$0xff]  }
  0x11   :  { %950 = vmatpush3.bf16.msra.mxu1 %v1070_v15  ;;  %v1095_v53 = vld [vmem:[%s1437_s1 + $0x158] sm:$0xff]   ;;  %v1097_v55 = vld [vmem:[%s1437_s1 + $0x150] sm:$0xff]   ;;  %v1103_v56 = vld [vmem:[%s1437_s1 + $0x180] sm:$0xff]  }
  0x12   :  { %951 = vmatprep.subr.bf16.mxu1 %v1073_v18  ;;  %v1096_v54 = vld [vmem:[%s1437_s1 + $0x118] sm:$0xff]   ;;  %v32_v57 = vld [vmem:[%s1438_s0 + $0x28] sm:$0xff]  ;;  %v39_v58 = vld [vmem:[%s1438_s0 + $0x60] sm:$0xff] }
  0x13   :  { %930 = vmatpush3.bf16.msra.mxu0 %v1072_v17  ;;  %v1098_v59 = vld [vmem:[%s1437_s1 + $0x110] sm:$0xff]   ;;  %v46_v60 = vpack.c.bf16 %v39_v58, %v32_v57  ;;  %v40_v62 = vld [vmem:[%s1438_s0 + $0x68] sm:$0xff]  ;;  %v1101_v2 = vld [vmem:[%s1437_s1 + $0x140] sm:$0xff]  }
  0x14   :  { %931 = vmatprep.subr.bf16.mxu0 %v1075_v20  ;;  %v33_v61 = vld [vmem:[%s1438_s0 + $0x30] sm:$0xff]  ;;  %v1099_v63 = vld [vmem:[%s1437_s1 + $0x148] sm:$0xff]   ;;  %v1102_v3 = vld [vmem:[%s1437_s1 + $0x100] sm:$0xff]  }
  0x15   :  { %952 = vmatpush3.bf16.msra.mxu1 %v1074_v19  ;;  %v47_v0 = vpack.c.bf16 %v40_v62, %v33_v61  ;;  %v1100_v1 = vld [vmem:[%s1437_s1 + $0x108] sm:$0xff]   ;;  %v31_v4 = vld [vmem:[%s1438_s0 + $0x20] sm:$0xff]  ;;  %v38_v5 = vld [vmem:[%s1438_s0 + $0x58] sm:$0xff] }
  0x16   :  { %953 = vmatprep.subr.bf16.mxu1 %v1077_v22  ;;  %v45_v6 = vpack.c.bf16 %v38_v5, %v31_v4  ;;  %v1104_v7 = vld [vmem:[%s1439_s3 + $0x38] sm:$0xff]   ;;  %v1105_v8 = vld [vmem:[%s1439_s3 + $0x30] sm:$0xff]   ;;  %v1106_v9 = vld [vmem:[%s1439_s3 + $0x28] sm:$0xff]  }
  0x17   :  { %932 = vmatpush3.bf16.msra.mxu0 %v1076_v21  ;;  %v1107_v10 = vld [vmem:[%s1439_s3 + $0x20] sm:$0xff]   ;;  %v1108_v11 = vld [vmem:[%s1439_s3 + $0x18] sm:$0xff]   ;;  %v1109_v12 = vld [vmem:[%s1439_s3 + $0x10] sm:$0xff]  }
  0x18   :  { %933 = vmatprep.subr.bf16.mxu0 %v1079_v24  ;;  %v1110_v13 = vld [vmem:[%s1439_s3 + $0x8] sm:$0xff]   ;;  %v1111_v14 = vld [vmem:[%s1439_s3] sm:$0xff]   ;;  %v1112_v15 = vld [vmem:[%s1440_s5 + $0x38] sm:$0xff]  }
  0x19   :  { %954 = vmatpush3.bf16.msra.mxu1 %v1078_v23  ;;  %v1113_v16 = vld [vmem:[%s1440_s5 + $0x30] sm:$0xff]   ;;  %v1114_v17 = vld [vmem:[%s1440_s5 + $0x28] sm:$0xff]   ;;  %v1115_v18 = vld [vmem:[%s1440_s5 + $0x20] sm:$0xff]  }
  0x1a   :  { %955 = vmatprep.subr.bf16.mxu1 %v1081_v26  ;;  %v1116_v19 = vld [vmem:[%s1440_s5 + $0x18] sm:$0xff]   ;;  %v852_v32 = vld [vmem:[%s1441_s2] ss:$0 sm:$0xff] }
  0x1b   :  { %934 = vmatpush3.bf16.msra.mxu0 %v1080_v25  ;;  %v1119_v57 = vld [vmem:[%s1440_s5] sm:$0xff]  }
  0x1c   :  { %935 = vmatprep.subr.bf16.mxu0 %v1083_v28  ;;  %v903_v58 = vld [vmem:[%s1442_s4] ss:$0 sm:$0xff] }
  0x1d   :  { %956 = vmatpush3.bf16.msra.mxu1 %v1082_v27 }
  0x1e   :  { %957 = vmatprep.subr.bf16.mxu1 %v1085_v30 }
  0x1f   :  { %936 = vmatpush3.bf16.msra.mxu0 %v1084_v29 }
  0x20   :  { %965 = vmatprep.subr.bf16.mxu0 %v1087_v38 }
  0x21   :  { %958 = vmatpush3.bf16.msra.mxu1 %v1086_v34 }
  0x22   :  { %1007 = vmatprep.subr.bf16.mxu1 %v1120_v43  ;;  %484 = vmatmul.mubr.bf16.vlgmr.msra.gmra.mxu0 %v41_v37 }
  0x23   :  { %966 = vmatpush3.bf16.msra.mxu0 %v1088_v42  ;;  %565 = vmatprep.mubr.bf16.mxu0 %v46_v60 }
  0x24   :  { %525 = vmatmul.mubr.bf16.vlgmr.msra.gmra.mxu1 %v43_v46  ;;  %967 = vmatprep.subr.bf16.mxu0 %v1089_v47 }
  0x25   :  { %1009 = vmatprep.mubr.msk.bf16.mxu1 %vm1121_vm0, %v1120_v43  ;;  %1008 = vmatpush3.bf16.msra.mxu1 %v1103_v56  ;;  %v1118_v56 = vld [vmem:[%s1440_s5 + $0x8] sm:$0xff]  }
  0x26   :  { %1013 = vmatprep.subr.bf16.mxu1 %v1120_v43 }
  0x27   :  { %968 = vmatpush3.bf16.msra.mxu0 %v1090_v48 }
  0x28   :  { %969 = vmatprep.subr.bf16.mxu0 %v1091_v49 }
  0x2b   :  { %970 = vmatpush3.bf16.msra.mxu0 %v1092_v50 }
  0x2c   :  { %971 = vmatprep.subr.bf16.mxu0 %v1093_v51  ;;  %1010 = vmatmul.mubr.msk.bf16.vlgmr.msra.gmra.mxu1 %vm447_vm1, %v47_v0 }
  0x2d   :  { %1029 = vmatprep.mubr.msk.bf16.mxu1 %vm1121_vm0, %v1120_v43  ;;  %1014 = vmatpush3.bf16.msra.mxu1 %v1104_v7 }
  0x2e   :  { %1015 = vmatprep.subr.bf16.mxu1 %v1120_v43 }
  0x2f   :  { %972 = vmatpush3.bf16.msra.mxu0 %v1094_v52 }
  0x30   :  { %973 = vmatprep.subr.bf16.mxu0 %v1095_v53 }
  0x31   :  { %1016 = vmatpush3.bf16.msra.mxu1 %v1105_v8 }
  0x32   :  { %1017 = vmatprep.subr.bf16.mxu1 %v1120_v43 }
  0x33   :  { %974 = vmatpush3.bf16.msra.mxu0 %v1096_v54 }
  0x34   :  { %975 = vmatprep.subr.bf16.mxu0 %v1097_v55  ;;  %v1117_v55 = vld [vmem:[%s1440_s5 + $0x10] sm:$0xff]  }
  0x35   :  { %1018 = vmatpush3.bf16.msra.mxu1 %v1106_v9 }
  0x36   :  { %1019 = vmatprep.subr.bf16.mxu1 %v1120_v43 }
  0x37   :  { %976 = vmatpush3.bf16.msra.mxu0 %v1098_v59 }
  0x38   :  { %977 = vmatprep.subr.bf16.mxu0 %v1099_v63 }
  0x39   :  { %1020 = vmatpush3.bf16.msra.mxu1 %v1107_v10 }
  0x3a   :  { %1021 = vmatprep.subr.bf16.mxu1 %v1120_v43 }
  0x3b   :  { %978 = vmatpush3.bf16.msra.mxu0 %v1100_v1 }
  0x3c   :  { %979 = vmatprep.subr.bf16.mxu0 %v1101_v2 }
  0x3d   :  { %1022 = vmatpush3.bf16.msra.mxu1 %v1108_v11 }
  0x3e   :  { %1023 = vmatprep.subr.bf16.mxu1 %v1120_v43 }
  0x3f   :  { %980 = vmatpush3.bf16.msra.mxu0 %v1102_v3 }
  0x40   :  { %1033 = vmatprep.subr.bf16.mxu0 %v1120_v43 }
  0x41   :  { %1024 = vmatpush3.bf16.msra.mxu1 %v1109_v12 }
  0x42   :  { %566 = vmatmul.mubr.bf16.vlgmr.msra.gmra.mxu0 %v45_v6  ;;  %1025 = vmatprep.subr.bf16.mxu1 %v1120_v43 }
  0x43   :  { %1049 = vmatprep.mubr.msk.bf16.mxu0 %vm1121_vm0, %v1120_v43  ;;  %1034 = vmatpush3.bf16.msra.mxu0 %v1112_v15 }
  0x44   :  { %1035 = vmatprep.subr.bf16.mxu0 %v1120_v43 }
  0x45   :  { %1026 = vmatpush3.bf16.msra.mxu1 %v1110_v13 }
  0x46   :  { %1027 = vmatprep.subr.bf16.mxu1 %v1120_v43 }
  0x47   :  { %1036 = vmatpush3.bf16.msra.mxu0 %v1113_v16 }
  0x48   :  { %1037 = vmatprep.subr.bf16.mxu0 %v1120_v43 }
  0x49   :  { %1028 = vmatpush3.bf16.msra.mxu1 %v1111_v14 }
  0x4b   :  { %1038 = vmatpush3.bf16.msra.mxu0 %v1114_v17 }
  0x4c   :  { %1039 = vmatprep.subr.bf16.mxu0 %v1120_v43 }
  0x4f   :  { %1040 = vmatpush3.bf16.msra.mxu0 %v1115_v18 }
  0x50   :  { %1041 = vmatprep.subr.bf16.mxu0 %v1120_v43 }
  0x53   :  { %1042 = vmatpush3.bf16.msra.mxu0 %v1116_v19 }
  0x54   :  { %1043 = vmatprep.subr.bf16.mxu0 %v1120_v43 }
  0x57   :  { %1044 = vmatpush3.bf16.msra.mxu0 %v1117_v55 }
  0x58   :  { %1045 = vmatprep.subr.bf16.mxu0 %v1120_v43 }
  0x5b   :  { %1046 = vmatpush3.bf16.msra.mxu0 %v1118_v56 }
  0x5c   :  { %1047 = vmatprep.subr.bf16.mxu0 %v1120_v43  ;;  %v912_v43 = vld [vmem:[%s1443_s6] ss:$0 sm:$0xff] }
  0x5f   :  { %1048 = vmatpush3.bf16.msra.mxu0 %v1119_v57 }
  0xe2   :  { %v937_v23 = vpop.f32.mrf.mxu0 }
  0xe4   :  { %v959_v20 = vpop.f32.mrf.mxu1  ;;  %v938_v25 = vpop.f32.mrf.mxu0 }
  0xe5   :  { %v939_v31 = vadd.f32 %v938_v25, %v937_v23 }
  0xe6   :  { %v960_v21 = vpop.f32.mrf.mxu1  ;;  %v940_v28 = vpop.f32.mrf.mxu0 }
  0xe7   :  { %v486_v34 = vadd.f32 %v939_v31, %v852_v32  ;;  %v961_v35 = vadd.f32 %v960_v21, %v959_v20 }
  0xe8   :  { %v962_v22 = vpop.f32.mrf.mxu1  ;;  %v941_v33 = vpop.f32.mrf.mxu0 }
  0xe9   :  { %v942_v36 = vadd.f32 %v941_v33, %v940_v28  ;;  %v527_v39 = vadd.f32 %v961_v35, %v486_v34 }
  0xea   :  { %v963_v24 = vpop.f32.mrf.mxu1 }
  0xeb   :  { %v489_v40 = vadd.f32 %v942_v36, %v852_v32  ;;  %v964_v41 = vadd.f32 %v963_v24, %v962_v22 }
  0xec   :  { %v608_v26 = vpop.f32.mrf.mxu1 }
  0xed   :  { %v530_v47 = vadd.f32 %v964_v41, %v489_v40 }
  0xee   :  { %v1011_v27 = vpop.f32.mrf.mxu1 }
  0xf0   :  { %v611_v29 = vpop.f32.mrf.mxu1 }
  0xf2   :  { %v1012_v30 = vpop.f32.mrf.mxu1 }
 0x102   :  { %v981_v37 = vpop.f32.mrf.mxu0 }
 0x104   :  { %v982_v38 = vpop.f32.mrf.mxu0 }
 0x105   :  { %v983_v42 = vadd.f32 %v982_v38, %v981_v37 }
 0x106   :  { %v984_v44 = vpop.f32.mrf.mxu0 }
 0x107   :  { %v568_v45 = vadd.f32 %v983_v42, %v527_v39 }
 0x108   :  { %v985_v46 = vpop.f32.mrf.mxu0 }
 0x109   :  { %v986_v48 = vadd.f32 %v985_v46, %v984_v44  ;;  %v609_v49 = vadd.f32 %v608_v26, %v568_v45 }
 0x10b   :  { %v571_v50 = vadd.f32 %v986_v48, %v530_v47  ;;  %v615_v52 = vmax.f32 %v609_v49, 0.0 }
 0x10d   :  { %v612_v51 = vadd.f32 %v611_v29, %v571_v50 }
 0x10f   :  { %v616_v53 = vmax.f32 %v612_v51, 0.0 }
 0x111   :  { %v617_v54 = vpack.c.bf16 %v616_v53, %v615_v52 }
 0x113   :  { %1030 = vmatmul.mubr.bf16.vlgmr.msra.gmra.mxu1 %v617_v54 }
 0x1d3   :  { %v723_v59 = vpop.f32.mrf.mxu1 }
 0x1d4   :  { %v724_v61 = vadd.f32 %v903_v58, %v723_v59 }
 0x1d5   :  { %v1031_v60 = vpop.f32.mrf.mxu1 }
 0x1d6   :  { %v730_v1 = vmax.f32 %v724_v61, 0.0 }
 0x1d7   :  { %v726_v62 = vpop.f32.mrf.mxu1 }
 0x1d8   :  { %v727_v63 = vadd.f32 %v903_v58, %v726_v62 }
 0x1d9   :  { %v1032_v0 = vpop.f32.mrf.mxu1 }
 0x1da   :  { %v731_v2 = vmax.f32 %v727_v63, 0.0 }
 0x1dc   :  { %v732_v3 = vpack.c.bf16 %v731_v2, %v730_v1 }
 0x1de   :  { %1050 = vmatmul.mubr.bf16.vlgmr.msra.gmra.mxu0 %v732_v3 }
 0x29e   :  { %v838_v4 = vpop.f32.mrf.mxu0 }
 0x29f   :  { %v839_v5 = vadd.f32 %v912_v43, %v838_v4 }
 0x2a0   :  { %v1051_v6 = vpop.f32.mrf.mxu0 }
 0x2a1   :  { %846 = vst.msk [vmem:[%s1444_s7] sm:$0xff] %vm845_vm2, %v839_v5 }
 0x2a2   :  { %v841_v7 = vpop.f32.mrf.mxu0 }
 0x2a3   :  { %v842_v8 = vadd.f32 %v912_v43, %v841_v7 }
 0x2a4   :  { %v1052_v9 = vpop.f32.mrf.mxu0 }
 0x2a5   :  { %847 = vst.msk [vmem:[%s1444_s7 + $0x8] sm:$0xff] %vm845_vm2, %v842_v8 }

</bundles_post_ra>
